<compile_context>
chip_gen: v7x
topology: tpu7x:2x2x1
jax: 0.10.0
libtpu: 0.0.40
codegen_flags: <defaults>
</compile_context>

<pallas_src>
import jax
import jax.numpy as jnp
import numpy as np
from jax import lax
from jax.experimental import pallas as pl
from jax.experimental.pallas import tpu as pltpu


def _conv_bn_lrelu_kernel(x_ref, w_ref, t_ref, o_ref):
    """One (batch, H-tile) grid step.

    x_ref : (1, TH, K*Wp*Cin)   stacked row-band input, (kh, wp, cin) in lanes (bf16)
    w_ref : (K*Wp*Cin, W*Cout)  banded conv weight with BN scale folded in (bf16)
    t_ref : (1, W*Cout)         folded shift (conv bias + BN affine), tiled over W (f32)
    o_ref : (1, TH, W*Cout)     lane-dense output tile (bf16)
    """
    acc = jnp.dot(x_ref[0], w_ref[...], preferred_element_type=jnp.float32)
    y = acc + t_ref[0]
    y = jnp.maximum(y, 0.1 * y)            # LeakyReLU(0.1): single VPU op
    o_ref[0] = y.astype(o_ref.dtype)


def _pick_h_tile(n, h, min_parallel_steps=4, max_tile=128):
    """Largest 8-multiple H-tile that keeps >= ~min_parallel_steps grid points."""
    if h % 8 != 0:
        return h                           # monolithic fallback (demo-scale only)
    candidates = [t for t in range(8, min(h, max_tile) + 1, 8) if h % t == 0]
    best = candidates[0]
    for t in candidates:
        if n * (h // t) >= min_parallel_steps:
            best = t
    return best


def conv2d_bn_lrelu(x_nchw, weight, bias, gamma, beta, running_mean, running_var,
                    *, ksize, eps=1e-5, h_tile=None,
                    compute_dtype=jnp.bfloat16, out_dtype=jnp.bfloat16):
    """Forward pass matching IRN Conv2D (stride=1, padding=ksize//2, bn=True, bias=True).

    x_nchw : (N, Cin, H, W) f32;  weight : (Cout, Cin, K, K) f32 (PyTorch layout)
    returns: (N, Cout, H, W) in `out_dtype`
    """
    N, Cin, H, W = x_nchw.shape
    Cout = weight.shape[0]
    if ksize % 2 != 1:
        raise ValueError("only odd ksize reproduces PyTorch padding=K//2 'same' size")
    K = ksize
    pad = K // 2
    Hp, Wp = H + 2 * pad, W + 2 * pad

    if h_tile is None:
        h_tile = _pick_h_tile(N, H)
    assert H % h_tile == 0 and (h_tile % 8 == 0 or h_tile == H)

    # ---- plain-JAX glue (XLA-fusable): layout, padding, parameter folding ----
    # TODO(synk): in a channels-last end-to-end network the NCHW<->NHWC
    # transposes and jnp.pad would be dropped / fused into the producer layer.
    x = jnp.transpose(x_nchw, (0, 2, 3, 1))                          # NHWC
    x = jnp.pad(x, ((0, 0), (pad, pad), (pad, pad), (0, 0)))         # (N, Hp, Wp, Cin)
    x = x.reshape(N, Hp, Wp * Cin)
    # Stack the K row-bands along lanes:
    #   x_stack[n, r, kh*Wp*Cin + p*Cin + ci] = x_pad[n, r+kh, p, ci]
    # so each output row needs exactly one contiguous lane-dense operand row.
    x_stack = jnp.concatenate([x[:, kh:kh + H, :] for kh in range(K)], axis=-1)
    x_stack = x_stack.astype(compute_dtype)                          # (N, H, K*Wp*Cin)

    # Banded/expanded weight:
    #   wmat[kh*Wp*Cin + p*Cin + ci, w*Cout + co] = weight[co, ci, kh, p-w]
    #   if 0 <= p-w < K else 0.
    # TODO(synk): demo-only construction -- it spends ~W/K of the MXU FLOPs on
    # structural zeros and scales as K*Wp*Cin*W*Cout; for large W / channel
    # counts tile it along W (extra output-column grid axis) or switch back to
    # per-(kh,kw) Cin-contractions with pltpu.roll lane shifts.
    w_t = jnp.transpose(weight, (2, 3, 1, 0)).astype(jnp.float32)    # (Kh, Kw, Cin, Cout)
    sel = (jnp.arange(Wp)[:, None, None]
           == jnp.arange(W)[None, :, None] + jnp.arange(K)[None, None, :])
    wexp = jnp.einsum("pwk,hkio->hpiwo", sel.astype(jnp.float32), w_t)
    wexp = wexp.reshape(K * Wp * Cin, W * Cout)                      # f32

    # Fold eval-mode BatchNorm: scale into the weight columns (f32, before the
    # bf16 cast); conv bias + BN shift into a single per-channel add.
    scale = gamma / jnp.sqrt(running_var + eps)                      # (Cout,)
    shift = (bias - running_mean) * scale + beta                     # (Cout,)
    s_cols = jnp.tile(scale.astype(jnp.float32), W)                  # (W*Cout,)
    wmat = (wexp * s_cols[None, :]).astype(compute_dtype)            # (K*Wp*Cin, W*Cout)
    t_flat = jnp.tile(shift.astype(jnp.float32), W).reshape(1, W * Cout)

    # ---- VMEM budget & cost hint derived from the actual block footprint ----
    csize = jnp.dtype(compute_dtype).itemsize
    osize = jnp.dtype(out_dtype).itemsize
    x_blk = h_tile * K * Wp * Cin * csize
    w_blk = K * Wp * Cin * W * Cout * csize
    t_blk = W * Cout * 4
    o_blk = h_tile * W * Cout * osize
    # Default double-buffering on every operand.
    # TODO(synk): single-buffer the grid-invariant wmat/t_flat blocks
    # (pipeline_mode=pl.Buffered(1)) to reclaim VMEM headroom on v7x's 64 MiB.
    per_step = 2 * (x_blk + w_blk + t_blk + o_blk)
    vmem_limit = int(min(max(per_step + (8 << 20), 16 << 20), 100 << 20))

    cost = pl.CostEstimate(
        flops=2 * N * H * (K * Wp * Cin) * (W * Cout),
        transcendentals=0,
        bytes_accessed=(x_stack.size * csize + wmat.size * csize
                        + t_flat.size * 4 + N * H * W * Cout * osize),
    )

    out = pl.pallas_call(
        _conv_bn_lrelu_kernel,
        out_shape=jax.ShapeDtypeStruct((N, H, W * Cout), out_dtype),
        grid_spec=pltpu.PrefetchScalarGridSpec(
            num_scalar_prefetch=0,
            grid=(N, H // h_tile),
            in_specs=[
                # Input is H-tiled (depends on i) -> pipelined DMA per tile.
                pl.BlockSpec((1, h_tile, K * Wp * Cin), lambda n, i: (n, i, 0)),
                # Grid-invariant operands (weight, shift).
                pl.BlockSpec((K * Wp * Cin, W * Cout), lambda n, i: (0, 0)),
                pl.BlockSpec((1, W * Cout), lambda n, i: (0, 0)),
            ],
            out_specs=pl.BlockSpec((1, h_tile, W * Cout), lambda n, i: (n, i, 0)),
        ),
        compiler_params=pltpu.CompilerParams(
            dimension_semantics=("parallel", "parallel"),
            vmem_limit_bytes=vmem_limit,
        ),
        cost_estimate=cost,
    )(x_stack, wmat, t_flat)

    out = out.reshape(N, H, W, Cout)
    return jnp.transpose(out, (0, 3, 1, 2))                          # NCHW, out_dtype


def _reference(x_nchw, weight, bias, gamma, beta, running_mean, running_var,
               *, ksize, eps=1e-5, compute_dtype=jnp.bfloat16):
    """conv -> bias -> BatchNorm2d(eval) -> LeakyReLU(0.1).

    Applies the same operand rounding the kernel's MXU sees (x and the
    BN-scale-folded weight rounded to bf16), with f32 accumulation/epilogue.
    """
    pad = ksize // 2
    scale = gamma / jnp.sqrt(running_var + eps)
    shift = (bias - running_mean) * scale + beta
    w_eff = weight.astype(jnp.float32) * scale[:, None, None, None]
    w_eff = w_eff.astype(compute_dtype).astype(jnp.float32)
    xc = x_nchw.astype(compute_dtype).astype(jnp.float32)
    y = lax.conv_general_dilated(
        xc, w_eff, window_strides=(1, 1),
        padding=((pad, pad), (pad, pad)),
        dimension_numbers=("NCHW", "OIHW", "NCHW"),
        precision=lax.Precision.HIGHEST)
    y = y + shift.reshape(1, -1, 1, 1)
    return jnp.where(y >= 0, y, 0.1 * y)


if __name__ == "__main__":
    # Small shapes consistent with the module: batch=2, Cin=4, Cout=8, 16x16, ksize=3.
    N, Cin, Cout, H, W, K = 2, 4, 8, 16, 16, 3

    key = jax.random.PRNGKey(0)
    kx, kw, kb, kg, kbt, km, kv = jax.random.split(key, 7)

    x = jax.random.normal(kx, (N, Cin, H, W), dtype=jnp.float32)
    weight = jax.random.normal(kw, (Cout, Cin, K, K), dtype=jnp.float32) * 0.1
    bias = jax.random.normal(kb, (Cout,), dtype=jnp.float32) * 0.1

    # Eval-mode BatchNorm2d parameters / running statistics (non-trivial so the
    # scale/shift folding is actually exercised).
    gamma = 1.0 + 0.1 * jax.random.normal(kg, (Cout,), dtype=jnp.float32)
    beta = 0.1 * jax.random.normal(kbt, (Cout,), dtype=jnp.float32)
    running_mean = 0.1 * jax.random.normal(km, (Cout,), dtype=jnp.float32)
    running_var = jax.random.uniform(kv, (Cout,), minval=0.5, maxval=1.5,
                                     dtype=jnp.float32)

    out = conv2d_bn_lrelu(x, weight, bias, gamma, beta, running_mean,
                          running_var, ksize=K)
    out = jax.block_until_ready(out)

    ref = _reference(x, weight, bias, gamma, beta, running_mean, running_var,
                     ksize=K)
    # Kernel emits bf16; round the f32 reference the same way before comparing.
    ref_bf = ref.astype(jnp.bfloat16).astype(jnp.float32)
    np.testing.assert_allclose(np.asarray(out, dtype=np.float32),
                               np.asarray(ref_bf), rtol=2e-2, atol=2e-2)

    print("KERNEL_OK")
</pallas_src>

<mosaic_0001>
module attributes {stable_mosaic.version = 11 : i64} {
  func.func @_conv_bn_lrelu_kernel(%arg0: i32, %arg1: i32, %arg2: memref<1x8x216xbf16, #tpu.memory_space<vmem>>, %arg3: memref<216x128xbf16, #tpu.memory_space<vmem>>, %arg4: memref<1x128xf32, #tpu.memory_space<vmem>>, %arg5: memref<1x8x128xbf16, #tpu.memory_space<vmem>>) attributes {dimension_semantics = [#tpu.dimension_semantics<parallel>, #tpu.dimension_semantics<parallel>], iteration_bounds = array<i64: 2, 2>, scalar_prefetch = 0 : i64, scratch_operands = 0 : i64, tpu.core_type = #tpu.core_type<tc>, window_params = [{transform_indices = @transform_0, window_bounds = array<i64: 1, 8, 216>}, {pipeline_mode = #tpu.pipeline_mode<synchronous>, transform_indices = @transform_1, window_bounds = array<i64: 216, 128>}, {pipeline_mode = #tpu.pipeline_mode<synchronous>, transform_indices = @transform_2, window_bounds = array<i64: 1, 128>}, {transform_indices = @transform_3, window_bounds = array<i64: 1, 8, 128>}]} {
    %c0 = arith.constant 0 : index
    %c0_0 = arith.constant 0 : index
    %c0_1 = arith.constant 0 : index
    %0 = vector.load %arg2[%c0, %c0_0, %c0_1] : memref<1x8x216xbf16, #tpu.memory_space<vmem>>, vector<1x8x216xbf16>
    %1 = vector.shape_cast %0 : vector<1x8x216xbf16> to vector<8x216xbf16>
    %c0_2 = arith.constant 0 : index
    %c0_3 = arith.constant 0 : index
    %2 = vector.load %arg3[%c0_2, %c0_3] : memref<216x128xbf16, #tpu.memory_space<vmem>>, vector<216x128xbf16>
    %cst = arith.constant dense<0.000000e+00> : vector<8x128xf32>
    %3 = tpu.matmul %1, %2, %cst {dimension_numbers = #tpu.dot_dimension_numbers<[1], [0], [0], [1], [0, 0, 1, 1], [], []>} : vector<8x216xbf16>, vector<216x128xbf16>, vector<8x128xf32> -> vector<8x128xf32>
    %c0_4 = arith.constant 0 : index
    %c0_5 = arith.constant 0 : index
    %4 = vector.load %arg4[%c0_4, %c0_5] : memref<1x128xf32, #tpu.memory_space<vmem>>, vector<1x128xf32>
    %5 = vector.shape_cast %4 : vector<1x128xf32> to vector<128xf32>
    %6 = vector.shape_cast %5 : vector<128xf32> to vector<1x128xf32>
    %7 = vector.broadcast %6 : vector<1x128xf32> to vector<8x128xf32>
    %8 = arith.addf %3, %7 : vector<8x128xf32>
    %cst_6 = arith.constant 1.000000e-01 : f32
    %9 = vector.broadcast %cst_6 : f32 to vector<8x128xf32>
    %10 = arith.mulf %9, %8 : vector<8x128xf32>
    %11 = arith.maximumf %8, %10 : vector<8x128xf32>
    %12 = arith.truncf %11 : vector<8x128xf32> to vector<8x128xbf16>
    %c0_7 = arith.constant 0 : index
    %c0_8 = arith.constant 0 : index
    %c0_9 = arith.constant 0 : index
    %13 = vector.load %arg5[%c0_7, %c0_8, %c0_9] : memref<1x8x128xbf16, #tpu.memory_space<vmem>>, vector<1x8x128xbf16>
    %14 = vector.shape_cast %13 : vector<1x8x128xbf16> to vector<8x128xbf16>
    %15 = vector.shape_cast %12 : vector<8x128xbf16> to vector<1x8x128xbf16>
    tpu.vector_store %arg5[%c0_7, %c0_8, %c0_9], %15 {strides = array<i32>} : memref<1x8x128xbf16, #tpu.memory_space<vmem>>, vector<1x8x128xbf16>,
    return
  }
  func.func @transform_0(%arg0: i32, %arg1: i32) -> (i32, i32, i32) {
    %c0_i32 = arith.constant 0 : i32
    %c0_i32_0 = arith.constant 0 : i32
    return %arg0, %arg1, %c0_i32 : i32, i32, i32
  }
  func.func @transform_1(%arg0: i32, %arg1: i32) -> (i32, i32) {
    %c0_i32 = arith.constant 0 : i32
    %c0_i32_0 = arith.constant 0 : i32
    %c0_i32_1 = arith.constant 0 : i32
    return %c0_i32, %c0_i32_0 : i32, i32
  }
  func.func @transform_2(%arg0: i32, %arg1: i32) -> (i32, i32) {
    %c0_i32 = arith.constant 0 : i32
    %c0_i32_0 = arith.constant 0 : i32
    %c0_i32_1 = arith.constant 0 : i32
    return %c0_i32, %c0_i32_0 : i32, i32
  }
  func.func @transform_3(%arg0: i32, %arg1: i32) -> (i32, i32, i32) {
    %c0_i32 = arith.constant 0 : i32
    %c0_i32_0 = arith.constant 0 : i32
    return %arg0, %arg1, %c0_i32 : i32, i32, i32
  }
}

</mosaic_0001>

<bundles_post_ra>
// kernel: tpu_custom_call.1
= control target key start
LH: loop header
LB: loop body
LE: loop exit
PB: predicated region body
PF: predicated region fallthrough
CT: control target
= control target key end

     0   :  { %s1081_s0 = inlined_call_operand.hbm [shape: bf16[2,16,216], index: 0, kind: input, shape index: {}]   ;;  %s1082_s1 = inlined_call_operand.hbm [shape: bf16[216,128], index: 1, kind: input, shape index: {}]   ;;  %s1083_s2 = inlined_call_operand.vmem [shape: f32[1,128], index: 2, kind: input, shape index: {}]   ;;  %s1084_s3 = inlined_call_operand.hbm [shape: bf16[2,16,128], index: 3, kind: output, shape index: {}]  }
   0x1   :  { %1093 = sst [smem:[#allocation15_spill]] %s1082_s1 }
   0x2   :  { %8 = vsyncpa [#allocation3], 0 }
   0x3   :  { %10 = vsyncpa [#allocation3 + $0x1], 0 }
   0x4   :  { %11 = vsyncpa [#allocation6], 0 }
   0x5   :  { %12 = vsyncpa [#allocation4], 0 }
   0x6   :  { %14 = vsyncpa [#allocation4 + $0x1], 0  ;;  %s839_s12 = smov 0   ;;  %s841_s13 = smov 0  }
   0x7   :  { %s843_s14 = smov 0   ;;  %s845_s15 = smov 0  }
   0x8   :  { %s847_s16 = smov 0   ;;  %s849_s17 = smov 0  }
   0x9   :  { %s851_s18 = smov 0   ;;  %s853_s19 = smov 0  }
   0xa LB: > { %1094 = sst [smem:[#allocation11_spill]] %s803_s17  ;;  %s507_s20 = sadd.s32 4294967295, %s811_s19   ;;  %s811_s19 = sphi %s853_s19, %s20_s19   ;;  %s807_s18 = sphi %s851_s18, %s1121_s18   ;;  %s803_s17 = sphi %s849_s17, %s1115_s17   ;;  %s799_s16 = sphi %s847_s16, %s1120_s16   ;;  %s795_s15 = sphi %s845_s15, %s1114_s15   ;;  %s791_s14 = sphi %s843_s14, %s1119_s14   ;;  %s787_s13 = sphi %s841_s13, %s1118_s13   ;;  %s783_s12 = sphi %s839_s12, %s1117_s12  }
   0xb   : > { %s508_s21 = sadd.s32 4294967294, %s811_s19   ;;  %p54_p0 = scmp.ne.s32.totalorder %s787_s13, %s783_s12 }
   0xc   : > { %p883_p1 = scmp.eq.s32.totalorder %s507_s20, 0  ;;  %p887_p2 = scmp.eq.s32.totalorder %s507_s20, 3 }
   0xd   : > { %p128_p3 = scmp.eq.s32.totalorder %s508_s21, 3  ;;  %p509_p5 = scmp.ge.s32.totalorder %s811_s19, 1 }
   0xe   : > { %s1095_s22 = scalar_select %p883_p1, 1, 0 }
   0xf   : > { %s1096_s23 = scalar_select %p887_p2, 1, 0 }
  0x10   : > { %p893_p4 = por %p883_p1, %p54_p0  ;;  %p898_p6 = por %p128_p3, %p54_p0 }
  0x11   : > { %p135_p7 = scmp.lt.s32.totalorder %s811_s19, 5  ;;  %s813_s27 = smov [#allocation5]  }
  0x12   : > { %s1097_s24 = scalar_select %p893_p4, 1, 0 }
  0x13   : > { %s1098_s25 = scalar_select %p898_p6, 1, 0 }
  0x14   : > { %p903_p8 = pnand %p509_p5, %p135_p7  ;;  %s147_s28 = sshll.u32 %s813_s27, 4  ;;  %s148_s28 = int_to_ptr.vmem [resolvable:$true] %s147_s28 }
  0x15   : > { %1099 = sst [smem:[#allocation12_spill]] %s1098_s25  ;;  %s1102_s1 = sld [smem:[#allocation15_spill]] }
  0x16   : > { %s1100_s26 = scalar_select %p903_p8, 1, 0 }
  0x17   : > { %p551_p9 = pneg %p903_p8 }
  0x19   : > { %p911_p10 = pnand %p551_p9, %p883_p1 }
  0x1b   : > { %s651_s5 = scalar_lea.hbm %s1102_s1, 1728  ;;  %p653_p12 = pneg %p911_p10 }
  0x1c   : > { %p652_p11 = scmp.ne.s32.totalorder %s1102_s1, %s651_s5  ;;  %p658_p3 = scmp.lt.u32.totalorder %s651_s5, %s1102_s1 }
  0x1e   : > { %p654_p13 = pnand %p653_p12, %p652_p11 }
  0x20   : > { %p655_p0 = pneg %p654_p13 }
  0x22   : > { %p660_p5 = pnand %p658_p3, %p655_p0 }
  0x24   : > { %663 = shalt.err (!%p660_p5)
}
  0x25   : > { %s664_s10 = scalar_lea.vmem %s148_s28, 1728  ;;  %p672_p1 = scmp.lt.s32.totalorder %s148_s28, %s148_s28 }
  0x26   : > { %p665_p7 = scmp.ne.s32.totalorder %s148_s28, %s664_s10  ;;  %p673_p4 = scmp.lt.s32.totalorder %s664_s10, %s664_s10 }
  0x28   : > { %p667_p9 = pnand %p665_p7, %p653_p12  ;;  %p674_p8 = por %p673_p4, %p672_p1 }
  0x2a   : > { %p668_p6 = pneg %p667_p9 }
  0x2c   : > { %p675_p2 = pnand %p674_p8, %p668_p6 }
  0x2e   : > { %678 = shalt.err (!%p675_p2)
}
  0x2f   : > { %s814_s11 = smov 64   ;;  %s815_s20 = smov 4  }
  0x30   : > { %554 = dma.hbm_to_vmem [thread:$0]  (!%p911_p10), %s1102_s1, 1728, %s148_s28, [#allocation6], %s814_s11, %s814_s11, %s815_s20  }
  0x31   : > { %s29_s30 = sadd.s32 1, %s803_s17  ;;  %s32_s4 = sadd.s32 1, %s807_s18 }
  0x32   : > { %p30_p1 = scmp.ge.s32.totalorder %s29_s30, 2  ;;  %s41_s5 = sadd.s32 1, %s791_s14 }
  0x33   : > { %p48_p2 = scmp.ne.s32.totalorder %s791_s14, %s787_s13  ;;  %p49_p4 = scmp.eq.s32.totalorder %s811_s19, 0 }
  0x34   : > { %s1123_s30 = smov (%p30_p1, %s29_s30), 0  ;;  %s1125_s4 = smov (!%p30_p1, %s32_s4), %s807_s18 }
  0x35   : > { %1103 = sst [smem:[#allocation13_spill]] %s1123_s30  ;;  %s37_s6 = ssub.s32 %s803_s17, %s1123_s30 }
  0x36   : > { %p34_p6 = scmp.ge.s32.totalorder %s1125_s4, 2  ;;  %p1104_p8 = scmp.ne.s32.totalorder %s1096_s23, 0 }
  0x37   : > { %p948_p10 = por %p49_p4, %p48_p2  ;;  %p564_p12 = scmp.lt.s32.totalorder %s811_s19, 4 }
  0x38   : > { %p944_p11 = por %p1104_p8, %p48_p2  ;;  %s1127_s4 = smov (%p34_p6, %s1125_s4), 0 }
  0x39   : > { %1107 = sst [smem:[#allocation14_spill]] %s1127_s4  ;;  %s164_s7 = sand.u32 1, %s791_s14  }
  0x3a   : > { %s513_s8 = sshll.u32 %s803_s17, 1  ;;  %s36_s9 = ssub.s32 %s807_s18, %s1127_s4 }
  0x3b   : > { %s38_s10 = sor.u32 %s37_s6, %s36_s9  ;;  %s512_s11 = sshll.u32 %s164_s7, 3 }
  0x3c   : > { %p39_p13 = scmp.eq.s32.totalorder %s38_s10, 0  ;;  %s514_s23 = sshll.u32 %s807_s18, 2 }
  0x3d   : > { %s168_s20 = scalar_lea.vmem [#allocation2], %s512_s11  ;;  %s174_s1 = sadd.s32 %s514_s23, %s513_s8 }
  0x3e   : > { %s178_s21 = sshll.u32 %s168_s20, 4  ;;  %s515_s30 = sshll.u32 %s174_s1, 6  ;;  %s963_s21 = int_to_ptr.vmem [resolvable:$true] %s178_s21 }
  0x3f   : > { %s961_s27 = scalar_select %p39_p13, %s791_s14, %s41_s5  }
  0x40   : > { %p969_p0 = pnand %p564_p12, %p948_p10  ;;  %s976_s6 = scalar_lea.hbm %s1081_s0, %s515_s30 }
  0x41   : > { %s165_s5 = scalar_lea.sflag [#allocation3], %s164_s7  ;;  %s679_s8 = scalar_lea.hbm %s976_s6, 128 }
  0x42   : > { %p680_p3 = scmp.ne.s32.totalorder %s976_s6, %s679_s8  ;;  %p681_p5 = pneg %p969_p0 }
  0x43   : > { %s684_s17 = scalar_lea.hbm %s1081_s0, 512  ;;  %p685_p1 = scmp.lt.u32.totalorder %s976_s6, %s1081_s0 }
  0x44   : > { %p682_p7 = pnand %p681_p5, %p680_p3  ;;  %p686_p2 = scmp.lt.u32.totalorder %s684_s17, %s679_s8 }
  0x45   : > { %p688_p6 = scmp.lt.u32.totalorder %s679_s8, %s976_s6 }
  0x46   : > { %p683_p9 = pneg %p682_p7  ;;  %p687_p4 = por %p686_p2, %p685_p1 }
  0x48   : > { %p689_p8 = por %p688_p6, %p687_p4 }
  0x4a   : > { %p690_p10 = pnand %p689_p8, %p683_p9 }
  0x4c   : > { %693 = shalt.err (!%p690_p10)
}
  0x4d   : > { %s694_s7 = scalar_lea.vmem %s963_s21, 128  ;;  %s816_s9 = smov [#allocation2]  }
  0x4e   : > { %p695_p12 = scmp.ne.s32.totalorder %s963_s21, %s694_s7  ;;  %s699_s10 = sshll.u32 %s816_s9, 4  ;;  %s700_s10 = int_to_ptr.vmem [resolvable:$false] %s699_s10 }
  0x4f   : > { %s701_s11 = scalar_lea.vmem %s700_s10, 256  ;;  %p702_p7 = scmp.lt.s32.totalorder %s963_s21, %s700_s10 }
  0x50   : > { %p697_p13 = pnand %p695_p12, %p681_p5  ;;  %p703_p1 = scmp.lt.s32.totalorder %s701_s11, %s694_s7 }
  0x52   : > { %p698_p3 = pneg %p697_p13  ;;  %p704_p2 = por %p703_p1, %p702_p7 }
  0x54   : > { %p705_p4 = pnand %p704_p2, %p698_p3 }
  0x56   : > { %708 = shalt.err (!%p705_p4)
}
  0x57   : > { %558 = dma.hbm_to_vmem [thread:$0]  (!%p969_p0), %s976_s6, 128, %s963_s21, %s165_s5  }
  0x58   : > { %p1109_p9 = scmp.ne.s32.totalorder %s1100_s26, 0 }
  0x59   : > { %s1006_s23 = sand.u32 (!%p1109_p9), 1, %s787_s13   ;;  %p1110_p5 = scmp.ne.s32.totalorder (!%p1109_p9), %s1097_s24, 0 }
  0x5a   : > { %187 = sbr.rel (%p1109_p9) target bundleno = 392 (0x188), region = 32  ;;  %s517_s20 = sshll.u32 (!%p1109_p9), %s1006_s23, 3 }
  0x5b   : > { %s190_s8 = scalar_lea.sflag (!%p1109_p9), [#allocation3], %s1006_s23  ;;  %s193_s1 = scalar_lea.vmem (!%p1109_p9), [#allocation2], %s517_s20 }
  0x61   : > { %770 = dma.done.wait (%p1110_p5), %s190_s8, 128  }
  0x62   : > { %772 = vsyncadd (%p1110_p5), %s190_s8, 4294967168  ;;  %p1111_p6 = scmp.ne.s32.totalorder %s1095_s22, 0 }
  0x64   : > { %774 = dma.done.wait (%p1111_p6), [#allocation6], 1728  }
  0x65   : > { %776 = vsyncadd (%p1111_p6), [#allocation6], 4294965568  ;;  %v817_v0 = vmov 0   ;;  %v635_v1 = vld [vmem:[#allocation5] sm:$0xff]   ;;  %v636_v2 = vld [vmem:[#allocation5 + $0x8] sm:$0xff]   ;;  %vm343_vm0 = vcmask 719872  }
  0x66   : > { %351 = vmatprep.subr.bf16.mxu0 %v817_v0  ;;  %v637_v3 = vld [vmem:[#allocation5 + $0x10] sm:$0xff]   ;;  %v638_v4 = vld [vmem:[#allocation5 + $0x18] sm:$0xff]   ;;  %v639_v6 = vld [vmem:[#allocation5 + $0x20] sm:$0xff]   ;;  %vm347_vm1 = vcmask 1043456   ;;  %s519_s25 = sshll.u32 %s1006_s23, 2  ;;  %s539_s26 = sshll.u32 %s799_s16, 1 }
  0x67   : > { %352 = vmatpush1.bf16.msra.mxu0 %v635_v1  ;;  %v221_v5 = vld [vmem:[%s193_s1] sm:$0xff]  ;;  %v640_v8 = vld [vmem:[#allocation5 + $0x28] sm:$0xff]   ;;  %v643_v11 = vld [vmem:[#allocation5 + $0x40] sm:$0xff]   ;;  %s407_s21 = sadd.s32 %s795_s15, %s539_s26  ;;  %s219_s5 = scalar_lea.vmem [#allocation7], %s519_s25 }
  0x68   : > { %353 = vmatprep.subr.bf16.mxu0 %v817_v0  ;;  %v522_v7 = vcombine.high %v221_v5, %v221_v5  ;;  %v641_v9 = vld [vmem:[#allocation5 + $0x30] sm:$0xff]   ;;  %v642_v10 = vld [vmem:[#allocation5 + $0x38] sm:$0xff]   ;;  %v644_v12 = vld [vmem:[#allocation5 + $0x48] sm:$0xff]   ;;  %v521_v18 = vcombine.low %v221_v5, %v221_v5  ;;  %s540_s6 = sshll.u32 %s407_s21, 6  ;;  %s411_s28 = sshll.u32 %s219_s5, 4  ;;  %s1029_s28 = int_to_ptr.vmem [resolvable:$true] %s411_s28 }
  0x69   : > { %v645_v13 = vld [vmem:[#allocation5 + $0x50] sm:$0xff]   ;;  %v646_v14 = vld [vmem:[#allocation5 + $0x58] sm:$0xff]   ;;  %v647_v15 = vld [vmem:[#allocation5 + $0x60] sm:$0xff]   ;;  %s1027_s30 = scalar_lea.hbm %s1084_s3, %s540_s6  ;;  %s396_s15 = scalar_lea.sflag [#allocation4], %s1006_s23 }
  0x6a   : > { %537 = vmatprep.mubr.msk.bf16.mxu0 %vm343_vm0, %v522_v7  ;;  %v648_v16 = vld [vmem:[#allocation5 + $0x68] ss:$0 sps:$4 sm:$0xff]   ;;  %v520_v19 = vld [vmem:[%s1083_s2] ss:$0 sm:$0xff]  ;;  %s709_s16 = scalar_lea.vmem %s1029_s28, 64  ;;  %s818_s7 = smov [#allocation7]  }
  0x6b   : > { %354 = vmatpush1.bf16.msra.mxu0 %v636_v2  ;;  %v349_v17 = vsel %vm347_vm1, %v648_v16, 0  ;;  %p710_p0 = scmp.ne.s32.totalorder %s1029_s28, %s709_s16  ;;  %s713_s9 = sshll.u32 %s818_s7, 4  ;;  %s714_s9 = int_to_ptr.vmem [resolvable:$false] %s713_s9 }
  0x6c   : > { %355 = vmatprep.subr.bf16.mxu0 %v817_v0  ;;  %s715_s10 = scalar_lea.vmem %s714_s9, 128  ;;  %p716_p12 = scmp.lt.s32.totalorder %s1029_s28, %s714_s9 }
  0x6d   : > { %p711_p8 = pnand %p710_p0, %p944_p11  ;;  %p717_p13 = scmp.lt.s32.totalorder %s715_s10, %s709_s16 }
  0x6f   : > { %356 = vmatpush1.bf16.msra.mxu0 %v637_v3  ;;  %p712_p10 = pneg %p711_p8  ;;  %p718_p3 = por %p717_p13, %p716_p12 }
  0x70   : > { %357 = vmatprep.subr.bf16.mxu0 %v817_v0 }
  0x71   : > { %p719_p7 = pnand %p718_p3, %p712_p10 }
  0x73   : > { %358 = vmatpush1.bf16.msra.mxu0 %v638_v4 }
  0x74   : > { %359 = vmatprep.subr.bf16.mxu0 %v817_v0 }
  0x77   : > { %360 = vmatpush1.bf16.msra.mxu0 %v639_v6 }
  0x78   : > { %361 = vmatprep.subr.bf16.mxu0 %v817_v0 }
  0x7b   : > { %362 = vmatpush1.bf16.msra.mxu0 %v640_v8 }
  0x7c   : > { %363 = vmatprep.subr.bf16.mxu0 %v817_v0 }
  0x7f   : > { %364 = vmatpush1.bf16.msra.mxu0 %v641_v9 }
  0x80   : > { %365 = vmatprep.subr.bf16.mxu0 %v817_v0 }
  0x83   : > { %366 = vmatpush1.bf16.msra.mxu0 %v642_v10 }
  0x84   : > { %367 = vmatprep.subr.bf16.mxu0 %v817_v0 }
  0x87   : > { %368 = vmatpush1.bf16.msra.mxu0 %v643_v11 }
  0x88   : > { %369 = vmatprep.subr.bf16.mxu0 %v817_v0 }
  0x8b   : > { %370 = vmatpush1.bf16.msra.mxu0 %v644_v12 }
  0x8c   : > { %371 = vmatprep.subr.bf16.mxu0 %v817_v0 }
  0x8f   : > { %372 = vmatpush1.bf16.msra.mxu0 %v645_v13 }
  0x90   : > { %373 = vmatprep.subr.bf16.mxu0 %v817_v0 }
  0x93   : > { %374 = vmatpush1.bf16.msra.mxu0 %v646_v14 }
  0x94   : > { %375 = vmatprep.subr.bf16.mxu0 %v817_v0 }
  0x97   : > { %376 = vmatpush1.bf16.msra.mxu0 %v647_v15 }
  0x98   : > { %377 = vmatprep.subr.bf16.mxu0 %v817_v0 }
  0x9b   : > { %378 = vmatpush1.bf16.msra.mxu0 %v349_v17 }
  0x9e   : > { %384 = vmatmul.mubr.bf16.vlgmr.msra.gmra.mrb[0].mxu0 %v521_v18 }
 0x171   : > { %v385_v20 = vpop.f32.mrb[0].mxu0 }
 0x172   : > { %v386_v21 = vadd.f32 %v520_v19, %v385_v20  ;;  %v387_v22 = vpop.f32.mrb[1].mxu0 }
 0x173   : > { %v388_v23 = vpop.f32.mrb[2].mxu0 }
 0x174   : > { %v391_v24 = vmul.f32 0.1, %v386_v21  ;;  %v389_v25 = vpop.f32.mrb[3].mxu0 }
 0x176   : > { %v392_v26 = vmax.f32 %v386_v21, %v391_v24 }
 0x178   : > { %v393_v27 = vpack.c.bf16 %v392_v26, %v392_v26 }
 0x17a   : > { %394 = vst [vmem:[%s219_s5] sm:$0xf] %v393_v27 }
 0x17b   : > { %722 = shalt.err (!%p719_p7)
}
 0x17c   : > { %s723_s11 = scalar_lea.hbm %s1027_s30, 64  ;;  %s727_s8 = scalar_lea.hbm %s1084_s3, 256 }
 0x17d   : > { %p724_p1 = scmp.ne.s32.totalorder %s1027_s30, %s723_s11  ;;  %p728_p9 = scmp.lt.u32.totalorder %s1027_s30, %s1084_s3 }
 0x17e   : > { %p729_p5 = scmp.lt.u32.totalorder %s727_s8, %s723_s11  ;;  %p731_p0 = scmp.lt.u32.totalorder %s723_s11, %s1027_s30 }
 0x17f   : > { %p725_p2 = pnand %p724_p1, %p944_p11 }
 0x180   : > { %p730_p6 = por %p729_p5, %p728_p9 }
 0x181   : > { %p726_p4 = pneg %p725_p2 }
 0x182   : > { %p732_p8 = por %p731_p0, %p730_p6 }
 0x184   : > { %p733_p10 = pnand %p732_p8, %p726_p4 }
 0x186   : > { %736 = shalt.err (!%p733_p10)
}
 0x187   : > { %549 = dma.vmem_to_hbm [thread:$0]  (%p944_p11), %s1029_s28, 64, %s1027_s30, %s396_s15  }
 0x188 PF: > { %s1112_s24 = sld [smem:[#allocation12_spill]]  ;;  %p566_p12 = scmp.ge.s32.totalorder %s811_s19, 2 }
 0x189   : > { %s423_s25 = sand.u32 1, %s783_s12  }
 0x18a   : > { %s424_s26 = scalar_lea.sflag [#allocation4], %s423_s25 }
 0x18e   : > { %p1113_p13 = scmp.ne.s32.totalorder %s1112_s24, 0 }
 0x190   : > { %p560_p3 = pnand %p566_p12, %p1113_p13 }
 0x192   : > { %778 = dma.done.wait (!%p560_p3), %s424_s26, 64  }
 0x193   : > { %780 = vsyncadd (!%p560_p3), %s424_s26, 4294967232  ;;  %s20_s19 = sadd.s32 1, %s811_s19   ;;  %s1114_s15 = sld [smem:[#allocation11_spill]] }
 0x194   : > { %p17_p7 = scmp.ge.s32.totalorder %s20_s19, 6   ;;  %s1115_s17 = sld [smem:[#allocation13_spill]] }
 0x195   : > { %s1116_s29 = sld [smem:[#allocation14_spill]]  ;;  %s1117_s12 = smov %s787_s13 }
 0x196   : > { %s1118_s13 = smov %s791_s14  ;;  %s1119_s14 = smov %s961_s27 }
 0x197   : > { %s1120_s16 = smov %s807_s18  ;;  %19 = sbr.rel (!%p17_p7) target bundleno = 10 (0xa), region = 81 }
 0x19b   : > { %s1121_s18 = smov %s1116_s29 }
 0x19e   :  { %429 = vsyncpa [#allocation3], 1 }
 0x19f   :  { %431 = vsyncpa [#allocation3 + $0x1], 1 }
 0x1a0   :  { %432 = vsyncpa [#allocation6], 1 }
 0x1a1   :  { %433 = vsyncpa [#allocation4], 1 }
 0x1a2   :  { %435 = vsyncpa [#allocation4 + $0x1], 1 }

</bundles_post_ra>
